<compile_context>
chip_gen: v7x
topology: tpu7x:2x2x1
jax: 0.10.0
libtpu: 0.0.40
codegen_flags: <defaults>
</compile_context>

<pallas_src>
import math
import functools

import jax
import jax.numpy as jnp
from jax.experimental import pallas as pl
from jax.experimental.pallas import tpu as pltpu


# ---------------------------------------------------------------------------
# Fused MHA kernel: one grid step == one batch element, everything in VMEM.
# ---------------------------------------------------------------------------
def _mha_fused_kernel(q_ref, k_ref, v_ref, m_ref,
                      wq_ref, bq_ref, wk_ref, bk_ref, wv_ref, bv_ref,
                      wo_ref, bo_ref, g_ref, beta_ref, o_ref,
                      *, n_heads, d_k, d_v, scale, eps):
    H = n_heads
    S = q_ref.shape[1]
    HS = H * S

    x_q = q_ref[0]                      # (S, d_model) f32
    x_k = k_ref[0]
    x_v = v_ref[0]
    mask = m_ref[0]                     # (S, S) int32, 1 = masked

    # ---- QKV projections (one kernel invocation, three MXU passes) ----------
    q_proj = jnp.dot(x_q, wq_ref[...], preferred_element_type=jnp.float32) + bq_ref[...]
    k_proj = jnp.dot(x_k, wk_ref[...], preferred_element_type=jnp.float32) + bk_ref[...]
    v_proj = jnp.dot(x_v, wv_ref[...], preferred_element_type=jnp.float32) + bv_ref[...]

    # ---- faithful torch .view(B, H, -1, d_k) head split ---------------------
    # Row r of the flat (H*S, d) view is proj[r // H, (r % H)*d : (r % H + 1)*d].
    # Built with H constant 0/1 placement matmuls: P_c[r, s] = (r == s*H + c),
    # so  flat = sum_c P_c @ proj[:, c*d:(c+1)*d]   (no in-kernel reshape).
    r_idx = jax.lax.broadcasted_iota(jnp.int32, (HS, S), 0)
    s_idx = jax.lax.broadcasted_iota(jnp.int32, (HS, S), 1)
    place = [(r_idx == s_idx * H + c).astype(jnp.float32) for c in range(H)]

    def head_split(proj, d):
        parts = [jnp.dot(place[c], proj[:, c * d:(c + 1) * d],
                         preferred_element_type=jnp.float32) for c in range(H)]
        out = parts[0]
        for p in parts[1:]:
            out = out + p
        return out                      # (H*S, d): rows [h*S:(h+1)*S] == head h

    q_flat = head_split(q_proj, d_k)
    k_flat = head_split(k_proj, d_k)
    v_flat = head_split(v_proj, d_v)

    # ---- per-head attention + fused output projection ------------------------
    wo = wo_ref[...]                    # (H*d_v, d_model)
    resid = x_q
    acc = jnp.zeros(resid.shape, jnp.float32)
    neg_big = jnp.float32(-1e9)

    for h in range(H):                  # H is small & static -> unrolled
        q_h = q_flat[h * S:(h + 1) * S, :]
        k_h = k_flat[h * S:(h + 1) * S, :]
        v_h = v_flat[h * S:(h + 1) * S, :]

        # Q @ K^T without an explicit transpose: contract last dims directly.
        scores = jax.lax.dot_general(
            q_h, k_h, (((1,), (1,)), ((), ())),
            preferred_element_type=jnp.float32) * scale
        scores = jnp.where(mask != 0, neg_big, scores)

        # numerically stable softmax over keys
        scores = scores - jnp.max(scores, axis=-1, keepdims=True)
        e = jnp.exp(scores)
        inv_l = pl.reciprocal(jnp.sum(e, axis=-1, keepdims=True), approx=True)
        ctx_h = jnp.dot(e, v_h, preferred_element_type=jnp.float32) * inv_l

        # context.transpose(1,2).view(B,S,H*d_v) @ W_o == sum_h ctx_h @ W_o[h-block]
        acc = acc + jnp.dot(ctx_h, wo[h * d_v:(h + 1) * d_v, :],
                            preferred_element_type=jnp.float32)

    # ---- output bias + residual + LayerNorm ----------------------------------
    out = acc + bo_ref[...] + resid
    mean = jnp.mean(out, axis=-1, keepdims=True)
    var = jnp.mean((out - mean) ** 2, axis=-1, keepdims=True)
    xn = (out - mean) * jax.lax.rsqrt(var + eps)
    o_ref[0] = (xn * g_ref[...] + beta_ref[...]).astype(o_ref.dtype)


# ---------------------------------------------------------------------------
# Wrapper
# ---------------------------------------------------------------------------
def multi_head_attention(Q, K, V, attn_mask, params, *, n_heads, d_k, d_v, eps=1e-5):
    (wq, bq, wk, bk, wv, bv, wo, bo, gamma, beta) = params
    B, S, d_model = Q.shape
    mask = attn_mask.astype(jnp.int32)

    kern = functools.partial(_mha_fused_kernel, n_heads=n_heads, d_k=d_k, d_v=d_v,
                             scale=1.0 / math.sqrt(d_k), eps=eps)

    return pl.pallas_call(
        kern,
        out_shape=jax.ShapeDtypeStruct((B, S, d_model), Q.dtype),
        grid=(B,),
        in_specs=[
            pl.BlockSpec((1, S, d_model), lambda b: (b, 0, 0)),   # Q
            pl.BlockSpec((1, S, d_model), lambda b: (b, 0, 0)),   # K
            pl.BlockSpec((1, S, d_model), lambda b: (b, 0, 0)),   # V
            pl.BlockSpec((1, S, S), lambda b: (b, 0, 0)),         # attn_mask
            pl.BlockSpec(wq.shape, lambda b: (0, 0)),             # W_Q
            pl.BlockSpec(bq.shape, lambda b: (0, 0)),
            pl.BlockSpec(wk.shape, lambda b: (0, 0)),             # W_K
            pl.BlockSpec(bk.shape, lambda b: (0, 0)),
            pl.BlockSpec(wv.shape, lambda b: (0, 0)),             # W_V
            pl.BlockSpec(bv.shape, lambda b: (0, 0)),
            pl.BlockSpec(wo.shape, lambda b: (0, 0)),             # output linear
            pl.BlockSpec(bo.shape, lambda b: (0, 0)),
            pl.BlockSpec(gamma.shape, lambda b: (0, 0)),          # LN gamma
            pl.BlockSpec(beta.shape, lambda b: (0, 0)),           # LN beta
        ],
        out_specs=pl.BlockSpec((1, S, d_model), lambda b: (b, 0, 0)),
        compiler_params=pltpu.CompilerParams(dimension_semantics=("parallel",)),
    )(Q, K, V, mask, wq, bq, wk, bk, wv, bv, wo, bo, gamma, beta)


# ---------------------------------------------------------------------------
# Pure-JAX reference for verification (mirrors the PyTorch module exactly)
# ---------------------------------------------------------------------------
def reference(Q, K, V, attn_mask, params, *, n_heads, d_k, d_v):
    (wq, bq, wk, bk, wv, bv, wo, bo, gamma, beta) = params
    B, S, d_model = Q.shape
    q = (Q @ wq + bq).reshape(B, n_heads, S, d_k)     # torch .view semantics
    k = (K @ wk + bk).reshape(B, n_heads, S, d_k)
    v = (V @ wv + bv).reshape(B, n_heads, S, d_v)
    scores = jnp.einsum("bhqd,bhkd->bhqk", q, k) / math.sqrt(d_k)
    scores = jnp.where(attn_mask[:, None] != 0, -1e9, scores)
    attn = jax.nn.softmax(scores, axis=-1)
    ctx = jnp.einsum("bhqk,bhkd->bhqd", attn, v)
    ctx = jnp.transpose(ctx, (0, 2, 1, 3)).reshape(B, S, n_heads * d_v)
    out = ctx @ wo + bo + Q
    mean = out.mean(-1, keepdims=True)
    var = ((out - mean) ** 2).mean(-1, keepdims=True)
    return (out - mean) / jnp.sqrt(var + 1e-5) * gamma + beta


if __name__ == "__main__":
    # small shapes consistent with the module
    B, S, d_model = 2, 8, 32
    n_heads, d_k, d_v = 2, 8, 8

    key = jax.random.PRNGKey(0)
    keys = jax.random.split(key, 12)

    Q = jax.random.normal(keys[0], (B, S, d_model), jnp.float32)
    K = jax.random.normal(keys[1], (B, S, d_model), jnp.float32)
    V = jax.random.normal(keys[2], (B, S, d_model), jnp.float32)
    attn_mask = (jax.random.uniform(keys[3], (B, S, S)) < 0.2).astype(jnp.int32)

    def lin_w(k, din, dout):
        return 0.1 * jax.random.normal(k, (din, dout), jnp.float32)

    def lin_b(k, dout):
        return 0.1 * jax.random.normal(k, (1, dout), jnp.float32)

    params = (
        lin_w(keys[4], d_model, n_heads * d_k), lin_b(keys[5], n_heads * d_k),   # W_Q
        lin_w(keys[6], d_model, n_heads * d_k), lin_b(keys[7], n_heads * d_k),   # W_K
        lin_w(keys[8], d_model, n_heads * d_v), lin_b(keys[9], n_heads * d_v),   # W_V
        lin_w(keys[10], n_heads * d_v, d_model), lin_b(keys[11], d_model),       # output linear
        jnp.ones((1, d_model), jnp.float32),                                     # LN gamma
        jnp.zeros((1, d_model), jnp.float32),                                    # LN beta
    )

    out = multi_head_attention(Q, K, V, attn_mask, params,
                               n_heads=n_heads, d_k=d_k, d_v=d_v)
    out = jax.block_until_ready(out)

    ref = reference(Q, K, V, attn_mask, params, n_heads=n_heads, d_k=d_k, d_v=d_v)
    assert out.shape == (B, S, d_model)
    # tolerance relaxed slightly vs 1e-4 because the softmax denominator uses the
    # approximate EUP reciprocal (pl.reciprocal(approx=True)) per perf feedback.
    assert jnp.allclose(out, ref, atol=2e-3, rtol=2e-3), "mismatch vs reference"

    print("KERNEL_OK")
</pallas_src>

<mosaic_0001>
module attributes {stable_mosaic.version = 11 : i64} {
  func.func @_mha_fused_kernel(%arg0: i32, %arg1: memref<1x8x32xf32, #tpu.memory_space<vmem>>, %arg2: memref<1x8x32xf32, #tpu.memory_space<vmem>>, %arg3: memref<1x8x32xf32, #tpu.memory_space<vmem>>, %arg4: memref<1x8x8xi32, #tpu.memory_space<vmem>>, %arg5: memref<32x16xf32, #tpu.memory_space<vmem>>, %arg6: memref<1x16xf32, #tpu.memory_space<vmem>>, %arg7: memref<32x16xf32, #tpu.memory_space<vmem>>, %arg8: memref<1x16xf32, #tpu.memory_space<vmem>>, %arg9: memref<32x16xf32, #tpu.memory_space<vmem>>, %arg10: memref<1x16xf32, #tpu.memory_space<vmem>>, %arg11: memref<16x32xf32, #tpu.memory_space<vmem>>, %arg12: memref<1x32xf32, #tpu.memory_space<vmem>>, %arg13: memref<1x32xf32, #tpu.memory_space<vmem>>, %arg14: memref<1x32xf32, #tpu.memory_space<vmem>>, %arg15: memref<1x8x32xf32, #tpu.memory_space<vmem>>) attributes {dimension_semantics = [#tpu.dimension_semantics<parallel>], iteration_bounds = array<i64: 2>, scalar_prefetch = 0 : i64, scratch_operands = 0 : i64, tpu.core_type = #tpu.core_type<tc>, window_params = [{transform_indices = @transform_0, window_bounds = array<i64: 1, 8, 32>}, {transform_indices = @transform_1, window_bounds = array<i64: 1, 8, 32>}, {transform_indices = @transform_2, window_bounds = array<i64: 1, 8, 32>}, {transform_indices = @transform_3, window_bounds = array<i64: 1, 8, 8>}, {pipeline_mode = #tpu.pipeline_mode<synchronous>, transform_indices = @transform_4, window_bounds = array<i64: 32, 16>}, {pipeline_mode = #tpu.pipeline_mode<synchronous>, transform_indices = @transform_5, window_bounds = array<i64: 1, 16>}, {pipeline_mode = #tpu.pipeline_mode<synchronous>, transform_indices = @transform_6, window_bounds = array<i64: 32, 16>}, {pipeline_mode = #tpu.pipeline_mode<synchronous>, transform_indices = @transform_7, window_bounds = array<i64: 1, 16>}, {pipeline_mode = #tpu.pipeline_mode<synchronous>, transform_indices = @transform_8, window_bounds = array<i64: 32, 16>}, {pipeline_mode = #tpu.pipeline_mode<synchronous>, transform_indices = @transform_9, window_bounds = array<i64: 1, 16>}, {pipeline_mode = #tpu.pipeline_mode<synchronous>, transform_indices = @transform_10, window_bounds = array<i64: 16, 32>}, {pipeline_mode = #tpu.pipeline_mode<synchronous>, transform_indices = @transform_11, window_bounds = array<i64: 1, 32>}, {pipeline_mode = #tpu.pipeline_mode<synchronous>, transform_indices = @transform_12, window_bounds = array<i64: 1, 32>}, {pipeline_mode = #tpu.pipeline_mode<synchronous>, transform_indices = @transform_13, window_bounds = array<i64: 1, 32>}, {transform_indices = @transform_14, window_bounds = array<i64: 1, 8, 32>}]} {
    %c0 = arith.constant 0 : index
    %c0_0 = arith.constant 0 : index
    %c0_1 = arith.constant 0 : index
    %0 = vector.load %arg1[%c0, %c0_0, %c0_1] : memref<1x8x32xf32, #tpu.memory_space<vmem>>, vector<1x8x32xf32>
    %1 = vector.shape_cast %0 : vector<1x8x32xf32> to vector<8x32xf32>
    %c0_2 = arith.constant 0 : index
    %c0_3 = arith.constant 0 : index
    %c0_4 = arith.constant 0 : index
    %2 = vector.load %arg2[%c0_2, %c0_3, %c0_4] : memref<1x8x32xf32, #tpu.memory_space<vmem>>, vector<1x8x32xf32>
    %3 = vector.shape_cast %2 : vector<1x8x32xf32> to vector<8x32xf32>
    %c0_5 = arith.constant 0 : index
    %c0_6 = arith.constant 0 : index
    %c0_7 = arith.constant 0 : index
    %4 = vector.load %arg3[%c0_5, %c0_6, %c0_7] : memref<1x8x32xf32, #tpu.memory_space<vmem>>, vector<1x8x32xf32>
    %5 = vector.shape_cast %4 : vector<1x8x32xf32> to vector<8x32xf32>
    %c0_8 = arith.constant 0 : index
    %c0_9 = arith.constant 0 : index
    %c0_10 = arith.constant 0 : index
    %6 = vector.load %arg4[%c0_8, %c0_9, %c0_10] : memref<1x8x8xi32, #tpu.memory_space<vmem>>, vector<1x8x8xi32>
    %7 = vector.shape_cast %6 : vector<1x8x8xi32> to vector<8x8xi32>
    %c0_11 = arith.constant 0 : index
    %c0_12 = arith.constant 0 : index
    %8 = vector.load %arg5[%c0_11, %c0_12] : memref<32x16xf32, #tpu.memory_space<vmem>>, vector<32x16xf32>
    %cst = arith.constant dense<0.000000e+00> : vector<8x16xf32>
    %9 = tpu.matmul %1, %8, %cst {dimension_numbers = #tpu.dot_dimension_numbers<[1], [0], [0], [1], [0, 0, 1, 1], [], []>} : vector<8x32xf32>, vector<32x16xf32>, vector<8x16xf32> -> vector<8x16xf32>
    %c0_13 = arith.constant 0 : index
    %c0_14 = arith.constant 0 : index
    %10 = vector.load %arg6[%c0_13, %c0_14] : memref<1x16xf32, #tpu.memory_space<vmem>>, vector<1x16xf32>
    %11 = vector.broadcast %10 : vector<1x16xf32> to vector<8x16xf32>
    %12 = arith.addf %9, %11 : vector<8x16xf32>
    %c0_15 = arith.constant 0 : index
    %c0_16 = arith.constant 0 : index
    %13 = vector.load %arg7[%c0_15, %c0_16] : memref<32x16xf32, #tpu.memory_space<vmem>>, vector<32x16xf32>
    %cst_17 = arith.constant dense<0.000000e+00> : vector<8x16xf32>
    %14 = tpu.matmul %3, %13, %cst_17 {dimension_numbers = #tpu.dot_dimension_numbers<[1], [0], [0], [1], [0, 0, 1, 1], [], []>} : vector<8x32xf32>, vector<32x16xf32>, vector<8x16xf32> -> vector<8x16xf32>
    %c0_18 = arith.constant 0 : index
    %c0_19 = arith.constant 0 : index
    %15 = vector.load %arg8[%c0_18, %c0_19] : memref<1x16xf32, #tpu.memory_space<vmem>>, vector<1x16xf32>
    %16 = vector.broadcast %15 : vector<1x16xf32> to vector<8x16xf32>
    %17 = arith.addf %14, %16 : vector<8x16xf32>
    %c0_20 = arith.constant 0 : index
    %c0_21 = arith.constant 0 : index
    %18 = vector.load %arg9[%c0_20, %c0_21] : memref<32x16xf32, #tpu.memory_space<vmem>>, vector<32x16xf32>
    %cst_22 = arith.constant dense<0.000000e+00> : vector<8x16xf32>
    %19 = tpu.matmul %5, %18, %cst_22 {dimension_numbers = #tpu.dot_dimension_numbers<[1], [0], [0], [1], [0, 0, 1, 1], [], []>} : vector<8x32xf32>, vector<32x16xf32>, vector<8x16xf32> -> vector<8x16xf32>
    %c0_23 = arith.constant 0 : index
    %c0_24 = arith.constant 0 : index
    %20 = vector.load %arg10[%c0_23, %c0_24] : memref<1x16xf32, #tpu.memory_space<vmem>>, vector<1x16xf32>
    %21 = vector.broadcast %20 : vector<1x16xf32> to vector<8x16xf32>
    %22 = arith.addf %19, %21 : vector<8x16xf32>
    %23 = tpu.iota {dimensions = array<i32: 0>} : vector<16x8xi32>
    %24 = tpu.iota {dimensions = array<i32: 1>} : vector<16x8xi32>
    %c2_i32 = arith.constant 2 : i32
    %25 = vector.broadcast %c2_i32 : i32 to vector<16x8xi32>
    %26 = arith.muli %24, %25 : vector<16x8xi32>
    %c0_i32 = arith.constant 0 : i32
    %27 = vector.broadcast %c0_i32 : i32 to vector<16x8xi32>
    %28 = arith.addi %26, %27 : vector<16x8xi32>
    %29 = arith.cmpi eq, %23, %28 : vector<16x8xi32>
    %30 = arith.extui %29 : vector<16x8xi1> to vector<16x8xi32>
    %31 = arith.sitofp %30 : vector<16x8xi32> to vector<16x8xf32>
    %c2_i32_25 = arith.constant 2 : i32
    %32 = vector.broadcast %c2_i32_25 : i32 to vector<16x8xi32>
    %33 = arith.muli %24, %32 : vector<16x8xi32>
    %c1_i32 = arith.constant 1 : i32
    %34 = vector.broadcast %c1_i32 : i32 to vector<16x8xi32>
    %35 = arith.addi %33, %34 : vector<16x8xi32>
    %36 = arith.cmpi eq, %23, %35 : vector<16x8xi32>
    %37 = arith.extui %36 : vector<16x8xi1> to vector<16x8xi32>
    %38 = arith.sitofp %37 : vector<16x8xi32> to vector<16x8xf32>
    %39 = vector.extract_strided_slice %12 {offsets = [0, 0], sizes = [8, 8], strides = [1, 1]} : vector<8x16xf32> to vector<8x8xf32>
    %cst_26 = arith.constant dense<0.000000e+00> : vector<16x8xf32>
    %40 = tpu.matmul %31, %39, %cst_26 {dimension_numbers = #tpu.dot_dimension_numbers<[1], [0], [0], [1], [0, 0, 1, 1], [], []>} : vector<16x8xf32>, vector<8x8xf32>, vector<16x8xf32> -> vector<16x8xf32>
    %41 = vector.extract_strided_slice %12 {offsets = [0, 8], sizes = [8, 8], strides = [1, 1]} : vector<8x16xf32> to vector<8x8xf32>
    %cst_27 = arith.constant dense<0.000000e+00> : vector<16x8xf32>
    %42 = tpu.matmul %38, %41, %cst_27 {dimension_numbers = #tpu.dot_dimension_numbers<[1], [0], [0], [1], [0, 0, 1, 1], [], []>} : vector<16x8xf32>, vector<8x8xf32>, vector<16x8xf32> -> vector<16x8xf32>
    %43 = arith.addf %40, %42 : vector<16x8xf32>
    %44 = vector.extract_strided_slice %17 {offsets = [0, 0], sizes = [8, 8], strides = [1, 1]} : vector<8x16xf32> to vector<8x8xf32>
    %cst_28 = arith.constant dense<0.000000e+00> : vector<16x8xf32>
    %45 = tpu.matmul %31, %44, %cst_28 {dimension_numbers = #tpu.dot_dimension_numbers<[1], [0], [0], [1], [0, 0, 1, 1], [], []>} : vector<16x8xf32>, vector<8x8xf32>, vector<16x8xf32> -> vector<16x8xf32>
    %46 = vector.extract_strided_slice %17 {offsets = [0, 8], sizes = [8, 8], strides = [1, 1]} : vector<8x16xf32> to vector<8x8xf32>
    %cst_29 = arith.constant dense<0.000000e+00> : vector<16x8xf32>
    %47 = tpu.matmul %38, %46, %cst_29 {dimension_numbers = #tpu.dot_dimension_numbers<[1], [0], [0], [1], [0, 0, 1, 1], [], []>} : vector<16x8xf32>, vector<8x8xf32>, vector<16x8xf32> -> vector<16x8xf32>
    %48 = arith.addf %45, %47 : vector<16x8xf32>
    %49 = vector.extract_strided_slice %22 {offsets = [0, 0], sizes = [8, 8], strides = [1, 1]} : vector<8x16xf32> to vector<8x8xf32>
    %cst_30 = arith.constant dense<0.000000e+00> : vector<16x8xf32>
    %50 = tpu.matmul %31, %49, %cst_30 {dimension_numbers = #tpu.dot_dimension_numbers<[1], [0], [0], [1], [0, 0, 1, 1], [], []>} : vector<16x8xf32>, vector<8x8xf32>, vector<16x8xf32> -> vector<16x8xf32>
    %51 = vector.extract_strided_slice %22 {offsets = [0, 8], sizes = [8, 8], strides = [1, 1]} : vector<8x16xf32> to vector<8x8xf32>
    %cst_31 = arith.constant dense<0.000000e+00> : vector<16x8xf32>
    %52 = tpu.matmul %38, %51, %cst_31 {dimension_numbers = #tpu.dot_dimension_numbers<[1], [0], [0], [1], [0, 0, 1, 1], [], []>} : vector<16x8xf32>, vector<8x8xf32>, vector<16x8xf32> -> vector<16x8xf32>
    %53 = arith.addf %50, %52 : vector<16x8xf32>
    %c0_32 = arith.constant 0 : index
    %c0_33 = arith.constant 0 : index
    %54 = vector.load %arg11[%c0_32, %c0_33] : memref<16x32xf32, #tpu.memory_space<vmem>>, vector<16x32xf32>
    %cst_34 = arith.constant 0.000000e+00 : f32
    %55 = vector.broadcast %cst_34 : f32 to vector<8x32xf32>
    %56 = vector.extract_strided_slice %43 {offsets = [0, 0], sizes = [8, 8], strides = [1, 1]} : vector<16x8xf32> to vector<8x8xf32>
    %57 = vector.extract_strided_slice %48 {offsets = [0, 0], sizes = [8, 8], strides = [1, 1]} : vector<16x8xf32> to vector<8x8xf32>
    %58 = vector.extract_strided_slice %53 {offsets = [0, 0], sizes = [8, 8], strides = [1, 1]} : vector<16x8xf32> to vector<8x8xf32>
    %cst_35 = arith.constant dense<0.000000e+00> : vector<8x8xf32>
    %59 = tpu.matmul %56, %57, %cst_35 {dimension_numbers = #tpu.dot_dimension_numbers<[1], [1], [0], [0], [0, 0, 1, 0], [], []>} : vector<8x8xf32>, vector<8x8xf32>, vector<8x8xf32> -> vector<8x8xf32>
    %cst_36 = arith.constant 0.353553385 : f32
    %60 = vector.broadcast %cst_36 : f32 to vector<8x8xf32>
    %61 = arith.mulf %59, %60 : vector<8x8xf32>
    %c0_i32_37 = arith.constant 0 : i32
    %62 = vector.broadcast %c0_i32_37 : i32 to vector<8x8xi32>
    %63 = arith.cmpi ne, %7, %62 : vector<8x8xi32>
    %cst_38 = arith.constant -1.000000e+09 : f32
    %64 = vector.broadcast %cst_38 : f32 to vector<8x8xf32>
    %65 = arith.select %63, %64, %61 : vector<8x8xi1>, vector<8x8xf32>
    %cst_39 = arith.constant dense<0xFF800000> : vector<8xf32>
    %66 = vector.multi_reduction <maximumf>, %65, %cst_39 [1] : vector<8x8xf32> to vector<8xf32>
    %67 = vector.shape_cast %66 : vector<8xf32> to vector<8x1xf32>
    %68 = vector.broadcast %67 : vector<8x1xf32> to vector<8x8xf32>
    %69 = arith.subf %65, %68 : vector<8x8xf32>
    %70 = math.exp %69 : vector<8x8xf32>
    %cst_40 = arith.constant dense<0.000000e+00> : vector<8xf32>
    %71 = vector.multi_reduction <add>, %70, %cst_40 [1] : vector<8x8xf32> to vector<8xf32>
    %72 = vector.shape_cast %71 : vector<8xf32> to vector<8x1xf32>
    %73 = tpu.reciprocal %72 {approx = true} : vector<8x1xf32> -> vector<8x1xf32>
    %cst_41 = arith.constant dense<0.000000e+00> : vector<8x8xf32>
    %74 = tpu.matmul %70, %58, %cst_41 {dimension_numbers = #tpu.dot_dimension_numbers<[1], [0], [0], [1], [0, 0, 1, 1], [], []>} : vector<8x8xf32>, vector<8x8xf32>, vector<8x8xf32> -> vector<8x8xf32>
    %75 = vector.broadcast %73 : vector<8x1xf32> to vector<8x8xf32>
    %76 = arith.mulf %74, %75 : vector<8x8xf32>
    %77 = vector.extract_strided_slice %54 {offsets = [0, 0], sizes = [8, 32], strides = [1, 1]} : vector<16x32xf32> to vector<8x32xf32>
    %cst_42 = arith.constant dense<0.000000e+00> : vector<8x32xf32>
    %78 = tpu.matmul %76, %77, %cst_42 {dimension_numbers = #tpu.dot_dimension_numbers<[1], [0], [0], [1], [0, 0, 1, 1], [], []>} : vector<8x8xf32>, vector<8x32xf32>, vector<8x32xf32> -> vector<8x32xf32>
    %79 = arith.addf %55, %78 : vector<8x32xf32>
    %80 = vector.extract_strided_slice %43 {offsets = [8, 0], sizes = [8, 8], strides = [1, 1]} : vector<16x8xf32> to vector<8x8xf32>
    %81 = vector.extract_strided_slice %48 {offsets = [8, 0], sizes = [8, 8], strides = [1, 1]} : vector<16x8xf32> to vector<8x8xf32>
    %82 = vector.extract_strided_slice %53 {offsets = [8, 0], sizes = [8, 8], strides = [1, 1]} : vector<16x8xf32> to vector<8x8xf32>
    %cst_43 = arith.constant dense<0.000000e+00> : vector<8x8xf32>
    %83 = tpu.matmul %80, %81, %cst_43 {dimension_numbers = #tpu.dot_dimension_numbers<[1], [1], [0], [0], [0, 0, 1, 0], [], []>} : vector<8x8xf32>, vector<8x8xf32>, vector<8x8xf32> -> vector<8x8xf32>
    %cst_44 = arith.constant 0.353553385 : f32
    %84 = vector.broadcast %cst_44 : f32 to vector<8x8xf32>
    %85 = arith.mulf %83, %84 : vector<8x8xf32>
    %c0_i32_45 = arith.constant 0 : i32
    %86 = vector.broadcast %c0_i32_45 : i32 to vector<8x8xi32>
    %87 = arith.cmpi ne, %7, %86 : vector<8x8xi32>
    %cst_46 = arith.constant -1.000000e+09 : f32
    %88 = vector.broadcast %cst_46 : f32 to vector<8x8xf32>
    %89 = arith.select %87, %88, %85 : vector<8x8xi1>, vector<8x8xf32>
    %cst_47 = arith.constant dense<0xFF800000> : vector<8xf32>
    %90 = vector.multi_reduction <maximumf>, %89, %cst_47 [1] : vector<8x8xf32> to vector<8xf32>
    %91 = vector.shape_cast %90 : vector<8xf32> to vector<8x1xf32>
    %92 = vector.broadcast %91 : vector<8x1xf32> to vector<8x8xf32>
    %93 = arith.subf %89, %92 : vector<8x8xf32>
    %94 = math.exp %93 : vector<8x8xf32>
    %cst_48 = arith.constant dense<0.000000e+00> : vector<8xf32>
    %95 = vector.multi_reduction <add>, %94, %cst_48 [1] : vector<8x8xf32> to vector<8xf32>
    %96 = vector.shape_cast %95 : vector<8xf32> to vector<8x1xf32>
    %97 = tpu.reciprocal %96 {approx = true} : vector<8x1xf32> -> vector<8x1xf32>
    %cst_49 = arith.constant dense<0.000000e+00> : vector<8x8xf32>
    %98 = tpu.matmul %94, %82, %cst_49 {dimension_numbers = #tpu.dot_dimension_numbers<[1], [0], [0], [1], [0, 0, 1, 1], [], []>} : vector<8x8xf32>, vector<8x8xf32>, vector<8x8xf32> -> vector<8x8xf32>
    %99 = vector.broadcast %97 : vector<8x1xf32> to vector<8x8xf32>
    %100 = arith.mulf %98, %99 : vector<8x8xf32>
    %101 = vector.extract_strided_slice %54 {offsets = [8, 0], sizes = [8, 32], strides = [1, 1]} : vector<16x32xf32> to vector<8x32xf32>
    %cst_50 = arith.constant dense<0.000000e+00> : vector<8x32xf32>
    %102 = tpu.matmul %100, %101, %cst_50 {dimension_numbers = #tpu.dot_dimension_numbers<[1], [0], [0], [1], [0, 0, 1, 1], [], []>} : vector<8x8xf32>, vector<8x32xf32>, vector<8x32xf32> -> vector<8x32xf32>
    %103 = arith.addf %79, %102 : vector<8x32xf32>
    %c0_51 = arith.constant 0 : index
    %c0_52 = arith.constant 0 : index
    %104 = vector.load %arg12[%c0_51, %c0_52] : memref<1x32xf32, #tpu.memory_space<vmem>>, vector<1x32xf32>
    %105 = vector.broadcast %104 : vector<1x32xf32> to vector<8x32xf32>
    %106 = arith.addf %103, %105 : vector<8x32xf32>
    %107 = arith.addf %106, %1 : vector<8x32xf32>
    %cst_53 = arith.constant dense<0.000000e+00> : vector<8xf32>
    %108 = vector.multi_reduction <add>, %107, %cst_53 [1] : vector<8x32xf32> to vector<8xf32>
    %109 = vector.shape_cast %108 : vector<8xf32> to vector<8x1xf32>
    %cst_54 = arith.constant 3.200000e+01 : f32
    %110 = vector.broadcast %cst_54 : f32 to vector<8x1xf32>
    %111 = arith.divf %109, %110 : vector<8x1xf32>
    %112 = vector.broadcast %111 : vector<8x1xf32> to vector<8x32xf32>
    %113 = arith.subf %107, %112 : vector<8x32xf32>
    %114 = arith.mulf %113, %113 : vector<8x32xf32>
    %cst_55 = arith.constant dense<0.000000e+00> : vector<8xf32>
    %115 = vector.multi_reduction <add>, %114, %cst_55 [1] : vector<8x32xf32> to vector<8xf32>
    %116 = vector.shape_cast %115 : vector<8xf32> to vector<8x1xf32>
    %cst_56 = arith.constant 3.200000e+01 : f32
    %117 = vector.broadcast %cst_56 : f32 to vector<8x1xf32>
    %118 = arith.divf %116, %117 : vector<8x1xf32>
    %119 = vector.broadcast %111 : vector<8x1xf32> to vector<8x32xf32>
    %120 = arith.subf %107, %119 : vector<8x32xf32>
    %cst_57 = arith.constant 9.99999974E-6 : f32
    %121 = vector.broadcast %cst_57 : f32 to vector<8x1xf32>
    %122 = arith.addf %118, %121 : vector<8x1xf32>
    %123 = math.rsqrt %122 : vector<8x1xf32>
    %124 = vector.broadcast %123 : vector<8x1xf32> to vector<8x32xf32>
    %125 = arith.mulf %120, %124 : vector<8x32xf32>
    %c0_58 = arith.constant 0 : index
    %c0_59 = arith.constant 0 : index
    %126 = vector.load %arg13[%c0_58, %c0_59] : memref<1x32xf32, #tpu.memory_space<vmem>>, vector<1x32xf32>
    %127 = vector.broadcast %126 : vector<1x32xf32> to vector<8x32xf32>
    %128 = arith.mulf %125, %127 : vector<8x32xf32>
    %c0_60 = arith.constant 0 : index
    %c0_61 = arith.constant 0 : index
    %129 = vector.load %arg14[%c0_60, %c0_61] : memref<1x32xf32, #tpu.memory_space<vmem>>, vector<1x32xf32>
    %130 = vector.broadcast %129 : vector<1x32xf32> to vector<8x32xf32>
    %131 = arith.addf %128, %130 : vector<8x32xf32>
    %c0_62 = arith.constant 0 : index
    %c0_63 = arith.constant 0 : index
    %c0_64 = arith.constant 0 : index
    %132 = vector.load %arg15[%c0_62, %c0_63, %c0_64] : memref<1x8x32xf32, #tpu.memory_space<vmem>>, vector<1x8x32xf32>
    %133 = vector.shape_cast %132 : vector<1x8x32xf32> to vector<8x32xf32>
    %134 = vector.shape_cast %131 : vector<8x32xf32> to vector<1x8x32xf32>
    tpu.vector_store %arg15[%c0_62, %c0_63, %c0_64], %134 {strides = array<i32>} : memref<1x8x32xf32, #tpu.memory_space<vmem>>, vector<1x8x32xf32>,
    return
  }
  func.func @transform_0(%arg0: i32) -> (i32, i32, i32) {
    %c0_i32 = arith.constant 0 : i32
    %c0_i32_0 = arith.constant 0 : i32
    %c0_i32_1 = arith.constant 0 : i32
    return %arg0, %c0_i32, %c0_i32_0 : i32, i32, i32
  }
  func.func @transform_1(%arg0: i32) -> (i32, i32, i32) {
    %c0_i32 = arith.constant 0 : i32
    %c0_i32_0 = arith.constant 0 : i32
    %c0_i32_1 = arith.constant 0 : i32
    return %arg0, %c0_i32, %c0_i32_0 : i32, i32, i32
  }
  func.func @transform_2(%arg0: i32) -> (i32, i32, i32) {
    %c0_i32 = arith.constant 0 : i32
    %c0_i32_0 = arith.constant 0 : i32
    %c0_i32_1 = arith.constant 0 : i32
    return %arg0, %c0_i32, %c0_i32_0 : i32, i32, i32
  }
  func.func @transform_3(%arg0: i32) -> (i32, i32, i32) {
    %c0_i32 = arith.constant 0 : i32
    %c0_i32_0 = arith.constant 0 : i32
    %c0_i32_1 = arith.constant 0 : i32
    return %arg0, %c0_i32, %c0_i32_0 : i32, i32, i32
  }
  func.func @transform_4(%arg0: i32) -> (i32, i32) {
    %c0_i32 = arith.constant 0 : i32
    %c0_i32_0 = arith.constant 0 : i32
    %c0_i32_1 = arith.constant 0 : i32
    return %c0_i32, %c0_i32_0 : i32, i32
  }
  func.func @transform_5(%arg0: i32) -> (i32, i32) {
    %c0_i32 = arith.constant 0 : i32
    %c0_i32_0 = arith.constant 0 : i32
    %c0_i32_1 = arith.constant 0 : i32
    return %c0_i32, %c0_i32_0 : i32, i32
  }
  func.func @transform_6(%arg0: i32) -> (i32, i32) {
    %c0_i32 = arith.constant 0 : i32
    %c0_i32_0 = arith.constant 0 : i32
    %c0_i32_1 = arith.constant 0 : i32
    return %c0_i32, %c0_i32_0 : i32, i32
  }
  func.func @transform_7(%arg0: i32) -> (i32, i32) {
    %c0_i32 = arith.constant 0 : i32
    %c0_i32_0 = arith.constant 0 : i32
    %c0_i32_1 = arith.constant 0 : i32
    return %c0_i32, %c0_i32_0 : i32, i32
  }
  func.func @transform_8(%arg0: i32) -> (i32, i32) {
    %c0_i32 = arith.constant 0 : i32
    %c0_i32_0 = arith.constant 0 : i32
    %c0_i32_1 = arith.constant 0 : i32
    return %c0_i32, %c0_i32_0 : i32, i32
  }
  func.func @transform_9(%arg0: i32) -> (i32, i32) {
    %c0_i32 = arith.constant 0 : i32
    %c0_i32_0 = arith.constant 0 : i32
    %c0_i32_1 = arith.constant 0 : i32
    return %c0_i32, %c0_i32_0 : i32, i32
  }
  func.func @transform_10(%arg0: i32) -> (i32, i32) {
    %c0_i32 = arith.constant 0 : i32
    %c0_i32_0 = arith.constant 0 : i32
    %c0_i32_1 = arith.constant 0 : i32
    return %c0_i32, %c0_i32_0 : i32, i32
  }
  func.func @transform_11(%arg0: i32) -> (i32, i32) {
    %c0_i32 = arith.constant 0 : i32
    %c0_i32_0 = arith.constant 0 : i32
    %c0_i32_1 = arith.constant 0 : i32
    return %c0_i32, %c0_i32_0 : i32, i32
  }
  func.func @transform_12(%arg0: i32) -> (i32, i32) {
    %c0_i32 = arith.constant 0 : i32
    %c0_i32_0 = arith.constant 0 : i32
    %c0_i32_1 = arith.constant 0 : i32
    return %c0_i32, %c0_i32_0 : i32, i32
  }
  func.func @transform_13(%arg0: i32) -> (i32, i32) {
    %c0_i32 = arith.constant 0 : i32
    %c0_i32_0 = arith.constant 0 : i32
    %c0_i32_1 = arith.constant 0 : i32
    return %c0_i32, %c0_i32_0 : i32, i32
  }
  func.func @transform_14(%arg0: i32) -> (i32, i32, i32) {
    %c0_i32 = arith.constant 0 : i32
    %c0_i32_0 = arith.constant 0 : i32
    %c0_i32_1 = arith.constant 0 : i32
    return %arg0, %c0_i32, %c0_i32_0 : i32, i32, i32
  }
}

</mosaic_0001>

<bundles_post_ra>
// kernel: tpu_custom_call.1
= control target key start
LH: loop header
LB: loop body
LE: loop exit
PB: predicated region body
PF: predicated region fallthrough
CT: control target
= control target key end

     0   :  { %s2532_s0 = inlined_call_operand.vmem [shape: f32[2,8,32], index: 0, kind: input, shape index: {}]   ;;  %s2533_s1 = inlined_call_operand.vmem [shape: f32[2,8,32], index: 1, kind: input, shape index: {}]   ;;  %s2534_s2 = inlined_call_operand.vmem [shape: f32[2,8,32], index: 2, kind: input, shape index: {}]   ;;  %s2535_s3 = inlined_call_operand.vmem [shape: s32[2,8,8], index: 3, kind: input, shape index: {}]   ;;  %s2536_s4 = inlined_call_operand.vmem [shape: f32[32,16], index: 4, kind: input, shape index: {}]   ;;  %s2537_s5 = inlined_call_operand.vmem [shape: f32[1,16], index: 5, kind: input, shape index: {}]   ;;  %s2538_s6 = inlined_call_operand.vmem [shape: f32[32,16], index: 6, kind: input, shape index: {}]   ;;  %s2539_s7 = inlined_call_operand.vmem [shape: f32[1,16], index: 7, kind: input, shape index: {}]   ;;  %s2540_s8 = inlined_call_operand.vmem [shape: f32[32,16], index: 8, kind: input, shape index: {}]   ;;  %s2541_s9 = inlined_call_operand.vmem [shape: f32[1,16], index: 9, kind: input, shape index: {}]   ;;  %s2542_s10 = inlined_call_operand.vmem [shape: f32[16,32], index: 10, kind: input, shape index: {}]   ;;  %s2543_s11 = inlined_call_operand.vmem [shape: f32[1,32], index: 11, kind: input, shape index: {}]   ;;  %s2544_s12 = inlined_call_operand.vmem [shape: f32[1,32], index: 12, kind: input, shape index: {}]   ;;  %s2545_s13 = inlined_call_operand.vmem [shape: f32[1,32], index: 13, kind: input, shape index: {}]   ;;  %s2546_s14 = inlined_call_operand.hbm [shape: f32[2,8,32], index: 14, kind: output, shape index: {}]  }
   0x1   :  { %2550 = sst [smem:[#allocation8_spill]] %s2536_s4 }
   0x2   :  { %2551 = sst [smem:[#allocation9_spill]] %s2538_s6 }
   0x3   :  { %19 = vsyncpa [#allocation3], 0 }
   0x4   :  { %21 = vsyncpa [#allocation3 + $0x1], 0  ;;  %s2292_s29 = smov 0   ;;  %s2294_s30 = smov 0  }
   0x5   :  { %s2296_s15 = smov 0   ;;  %s2298_s16 = smov 0  }
   0x6 LB: > { %2552 = sst [smem:[#allocation5_spill]] %s2206_s15  ;;  %s2313_s17 = sadd.s32 4294967295, %s2210_s16   ;;  %s2210_s16 = sphi %s2298_s16, %s2559_s16   ;;  %s2206_s15 = sphi %s2296_s15, %s2561_s15   ;;  %s2202_s30 = sphi %s2294_s30, %s2563_s30   ;;  %s2198_s29 = sphi %s2292_s29, %s2562_s29  }
   0x7   : > { %s1887_s18 = sadd.s32 4294967294, %s2210_s16   ;;  %s2317_s19 = sadd.s32 1, %s2210_s16  }
   0x8   : > { %2553 = sst [smem:[#allocation6_spill]] %s2317_s19  ;;  %s348_s20 = sadd.s32 1, %s2206_s15 }
   0x9   : > { %s345_s21 = ssub.s32 %s2210_s16, %s2317_s19  ;;  %p358_p0 = scmp.ne.s32.totalorder %s2206_s15, %s2202_s30 }
   0xa   : > { %p346_p1 = scmp.eq.s32.totalorder %s345_s21, 0  ;;  %p359_p2 = scmp.eq.s32.totalorder %s2313_s17, 1 }
   0xb   : > { %p364_p3 = scmp.ne.s32.totalorder %s2202_s30, %s2198_s29  ;;  %p365_p4 = scmp.eq.s32.totalorder %s1887_s18, 1 }
   0xc   : > { %s2328_s22 = scalar_select %p346_p1, %s2206_s15, %s348_s20  }
   0xd   : > { %p2330_p5 = por %p359_p2, %p358_p0  ;;  %p2334_p6 = por %p365_p4, %p364_p3 }
   0xe   : > { %2554 = sst [smem:[#allocation7_spill]] %s2328_s22  ;;  %p1890_p7 = scmp.ge.s32.totalorder %s2210_s16, 1 }
   0xf   : > { %p441_p8 = scmp.lt.s32.totalorder %s2210_s16, 3 }
  0x11   : > { %p442_p9 = pnand %p1890_p7, %p441_p8 }
  0x12   : > { %s2557_s6 = sld [smem:[#allocation9_spill]] (!%p442_p9)  ;;  %s2558_s4 = sld [smem:[#allocation8_spill]] (!%p442_p9)  ;;  %v2212_v3 = vmov (!%p442_p9), 0.0|0.0   ;;  %vm2213_vm0 = vmmov (!%p442_p9), 0   ;;  %v2214_v9 = vmov (!%p442_p9), 0.0   ;;  %v687_v14 = vld [vmem:[%s2540_s8] sm:$0xff] (!%p442_p9)  ;;  %v771_v23 = vlaneseq (!%p442_p9) }
  0x13   : > { %445 = sbr.rel (%p442_p9) target bundleno = 1726 (0x6be), region = 76  ;;  %2077 = vmatprep.subr.bf16.mxu1 (!%p442_p9), %v2212_v3  ;;  %2071 = vmatprep.subr.bf16.mxu0 (!%p442_p9), %v2212_v3  ;;  %p498_p10 = scmp.lt.s32.totalorder (!%p442_p9), %s2313_s17, 1  ;;  %v688_v15 = vld [vmem:[%s2540_s8 + $0x8] sm:$0xff] (!%p442_p9)  ;;  %vm529_vm1 = vcmask (!%p442_p9), 261120   ;;  %v689_v19 = vld [vmem:[%s2540_s8 + $0x10] sm:$0xff] (!%p442_p9)  ;;  %v690_v20 = vld [vmem:[%s2540_s8 + $0x18] sm:$0xff] (!%p442_p9) }
  0x14   : > { %1997 = vmatprep.mubr.msk.f32.mxu1 (!%p442_p9), %vm2213_vm0, %v2214_v9  ;;  %1986 = vmatprep.mubr.msk.f32.mxu0 (!%p442_p9), %vm2213_vm0, %v2214_v9  ;;  %v2084_v18 = vpack.c.bf16 (!%p442_p9), %v688_v15, %v687_v14  ;;  %v2087_v21 = vpack.c.bf16 (!%p442_p9), %v690_v20, %v689_v19  ;;  %v775_v24 = vand.u32 (!%p442_p9), 127, %v771_v23  ;;  %v772_v26 = vshrl.u32 (!%p442_p9), %v771_v23, 7  ;;  %v1898_v30 = vld [vmem:[%s2539_s7] ss:$0 sm:$0xff] (!%p442_p9) }
  0x15   : > { %vm794_vm3 = vcmask (!%p442_p9), 64512   ;;  %v1896_v32 = vld [vmem:[%s2537_s5] ss:$0 sm:$0xff] (!%p442_p9) }
  0x16   : > { %v776_v25 = vmul.u32 (!%p442_p9), 2, %v775_v24  ;;  %v773_v28 = vadd.s32 (!%p442_p9), 8, %v772_v26  ;;  %v1900_v38 = vld [vmem:[%s2541_s9] ss:$0 sm:$0xff] (!%p442_p9) }
  0x18   : > { %v603_v0 = vld [vmem:[%s2557_s6] sm:$0xff] (!%p442_p9)  ;;  %v604_v1 = vld [vmem:[%s2557_s6 + $0x8] sm:$0xff] (!%p442_p9)  ;;  %v605_v6 = vld [vmem:[%s2557_s6 + $0x10] sm:$0xff] (!%p442_p9)  ;;  %v783_v27 = vadd.s32 (!%p442_p9), 1, %v776_v25  ;;  %vm777_vm5 = vcmp.eq.s32.totalorder (!%p442_p9), %v772_v26, %v776_v25  ;;  %vm778_vm6 = vcmp.eq.s32.totalorder (!%p442_p9), %v773_v28, %v776_v25 }
  0x19   : > { %v518_v2 = vld [vmem:[%s2558_s4] sm:$0xff] (!%p442_p9)  ;;  %v2078_v4 = vpack.c.bf16 (!%p442_p9), %v604_v1, %v603_v0  ;;  %v519_v5 = vld [vmem:[%s2558_s4 + $0x8] sm:$0xff] (!%p442_p9)  ;;  %v606_v7 = vld [vmem:[%s2557_s6 + $0x18] sm:$0xff] (!%p442_p9)  ;;  %v1902_v44 = vsel (!%p442_p9), %vm777_vm5, 1.0, %v2214_v9  ;;  %v1903_v46 = vsel (!%p442_p9), %vm778_vm6, 1.0, %v2214_v9 }
  0x1a   : > { %v2072_v8 = vpack.c.bf16 %v519_v5, %v518_v2  ;;  %v520_v10 = vld [vmem:[%s2558_s4 + $0x10] sm:$0xff]  ;;  %v521_v11 = vld [vmem:[%s2558_s4 + $0x18] sm:$0xff]  ;;  %v2081_v12 = vpack.c.bf16 %v606_v7, %v605_v6  ;;  %s499_s15 = scalar_select %p498_p10, %s2313_s17, 1  ;;  %vm784_vm2 = vcmp.eq.s32.totalorder %v772_v26, %v783_v27  ;;  %vm785_vm4 = vcmp.eq.s32.totalorder %v773_v28, %v783_v27  ;;  %v1926_v27 = vld [vmem:[%s2543_s11] ss:$0 sm:$0xff] }
  0x1b   : > { %2079 = vmatpush3.bf16.msra.mxu1 %v2078_v4  ;;  %v2075_v13 = vpack.c.bf16 %v521_v11, %v520_v10  ;;  %v1904_v29 = vsel %vm784_vm2, 1.0, %v2214_v9  ;;  %v1905_v43 = vsel %vm785_vm4, 1.0, %v2214_v9 }
  0x1c   : > { %2073 = vmatpush3.bf16.msra.mxu0 %v2072_v8  ;;  %2080 = vmatprep.subr.bf16.mxu1 %v2212_v3  ;;  %s2370_s21 = sshll.u32 %s499_s15, 3  ;;  %s2215_s15 = smov 120  }
  0x1d   : > { %2074 = vmatprep.subr.bf16.mxu0 %v2212_v3  ;;  %s505_s20 = scalar_lea.vmem %s2533_s1, %s2370_s21  ;;  %s501_s19 = scalar_lea.vmem %s2532_s0, %s2370_s21 }
  0x1e   : > { %v515_v16 = vld [vmem:[%s505_s20] sm:$0xff]  ;;  %s513_s6 = scalar_lea.vmem %s2535_s3, %s2370_s21 }
  0x1f   : > { %2082 = vmatpush3.bf16.msra.mxu1 %v2081_v12  ;;  %v2386_v17 = vld [vmem:[%s501_s19] sm:$0xff]  ;;  %s509_s19 = scalar_lea.vmem %s2534_s2, %s2370_s21  ;;  %s1930_s21 = sshll.u32 %s2313_s17, 7 }
  0x20   : > { %2076 = vmatpush3.bf16.msra.mxu0 %v2075_v13  ;;  %v516_v22 = vld [vmem:[%s509_s19] sm:$0xff]  ;;  %v1266_v13 = vld [vmem:[%s2542_s10 + $0x8] sm:$0xff]  ;;  %s2489_s20 = scalar_lea.hbm %s2546_s14, %s1930_s21  ;;  %s2216_s17 = smov [#allocation2]  }
  0x21   : > { %2083 = vmatprep.subr.bf16.mxu0 %v2212_v3  ;;  %v517_v52 = vld [vmem:[%s513_s6] sm:$0xff] }
  0x22   : > { %1998 = vmatmul.mubr.msk.f32.vlgmr.msra.gmra.mrb[0].mxu1 %vm529_vm1, %v515_v16  ;;  %vm1344_vm7 = vcmp.ne.s32.totalorder %v517_v52, 0  ;;  %v1265_v12 = vld [vmem:[%s2542_s10] sm:$0xff] }
  0x23   : > { %1987 = vmatmul.mubr.msk.f32.vlgmr.msra.gmra.mrb[0].mxu0 %vm529_vm1, %v2386_v17  ;;  %2013 = vmatprep.mubr.msk.f32.mxu1 %vm794_vm3, %v1904_v29 }
  0x24   : > { %2085 = vmatpush3.bf16.msra.mxu0 %v2084_v18  ;;  %2008 = vmatprep.mubr.msk.f32.mxu0 %vm2213_vm0, %v2214_v9 }
  0x25   : > { %2086 = vmatprep.subr.bf16.mxu0 %v2212_v3 }
  0x28   : > { %2088 = vmatpush3.bf16.msra.mxu0 %v2087_v21 }
  0x2b   : > { %2009 = vmatmul.mubr.msk.f32.vlgmr.msra.gmra.mrb[2].mxu0 %vm529_vm1, %v516_v22 }
  0x2c   : > { %2023 = vmatprep.mubr.msk.f32.mxu0 %vm794_vm3, %v1904_v29 }
  0xf5   : > { %v683_v31 = vpop.f32.mrb[0].mxu1 }
  0xf6   : > { %v684_v33 = vadd.f32 %v1898_v30, %v683_v31  ;;  %v1999_v34 = vpop.f32.mrb[1].mxu1  ;;  %v599_v35 = vpop.f32.mrb[0].mxu0 }
  0xf7   : > { %v1988_v36 = vpop.f32.mrb[1].mxu0  ;;  %v600_v37 = vadd.f32 %v1896_v32, %v599_v35 }
  0xf8   : > { %958 = vrot.lane.b32.xlu0 %v684_v33, %s2215_s15 }
  0xfc   : > { %791 = vrot.lane.b32.xlu0 %v600_v37, %s2215_s15 }
  0xfe   : > { %v767_v39 = vpop.f32.mrb[2].mxu0 }
  0xff   : > { %v768_v40 = vadd.f32 %v1900_v38, %v767_v39  ;;  %v2010_v41 = vpop.f32.mrb[3].mxu0 }
 0x101   : > { %1112 = vrot.lane.b32.xlu1 %v768_v40, %s2215_s15  ;;  %s495_s15 = sand.u32 1, %s2202_s30  }
 0x102   : > { %s1891_s25 = sshll.u32 %s495_s15, 3  ;;  %s1779_s26 = scalar_lea.sflag [#allocation3], %s495_s15 }
 0x103   : > { %s497_s19 = scalar_lea.vmem [#allocation2], %s1891_s25  ;;  %s2152_s25 = sshll.u32 %s2216_s17, 4  ;;  %s2153_s25 = int_to_ptr.vmem [resolvable:$false] %s2152_s25 }
 0x104   : > { %s1792_s28 = sshll.u32 %s497_s19, 4  ;;  %s2154_s4 = scalar_lea.vmem %s2153_s25, 256  ;;  %s2491_s28 = int_to_ptr.vmem [resolvable:$true] %s1792_s28 }
 0x105   : > { %s2148_s27 = scalar_lea.vmem %s2491_s28, 128  ;;  %p2155_p0 = scmp.lt.s32.totalorder %s2491_s28, %s2153_s25 }
 0x106   : > { %p2149_p11 = scmp.ne.s32.totalorder %s2491_s28, %s2148_s27  ;;  %p2156_p1 = scmp.lt.s32.totalorder %s2154_s4, %s2148_s27 }
 0x108   : > { %p2150_p12 = pnand %p2149_p11, %p2330_p5  ;;  %p2157_p2 = por %p2156_p1, %p2155_p0 }
 0x10a   : > { %p2151_p13 = pneg %p2150_p12 }
 0x10c   : > { %p2158_p3 = pnand %p2157_p2, %p2151_p13 }
 0x16a   : > { %v959_v42 = vpop.permute.xlu0 %958 }
 0x16b   : > { %2021 = vmatprep.subr.mxu0 %v959_v42 }
 0x16c   : > { %2022 = vmatpush3.msra.mxu0 %v959_v42 }
 0x16d   : > { %2024 = vmatmul.mubr.msk.f32.vlgmr.msra.gmra.mrb[4].mxu0 %vm794_vm3, %v1905_v43  ;;  %2026 = vmatprep.subr.mxu0 %v684_v33 }
 0x16e   : > { %2027 = vmatpush3.msra.mxu0 %v684_v33  ;;  %v792_v45 = vpop.permute.xlu0 %791  ;;  %2028 = vmatprep.mubr.msk.f32.mxu0 %vm794_vm3, %v1902_v44 }
 0x16f   : > { %2011 = vmatprep.subr.mxu1 %v792_v45  ;;  %2041 = vmatprep.subr.mxu0 %v2214_v9 }
 0x170   : > { %2012 = vmatpush3.msra.mxu1 %v792_v45 }
 0x171   : > { %2014 = vmatmul.mubr.msk.f32.vlgmr.msra.gmra.mrb[2].mxu1 %vm794_vm3, %v1905_v43  ;;  %2016 = vmatprep.subr.mxu1 %v600_v37 }
 0x172   : > { %2017 = vmatpush3.msra.mxu1 %v600_v37  ;;  %2018 = vmatprep.mubr.msk.f32.mxu1 %vm794_vm3, %v1902_v44 }
 0x173   : > { %v1113_v47 = vpop.permute.xlu1 %1112 }
 0x174   : > { %2031 = vmatprep.subr.mxu1 %v1113_v47 }
 0x175   : > { %2029 = vmatmul.mubr.msk.f32.vlgmr.msra.gmra.mrb[4].mxu0 %vm794_vm3, %v1903_v46 }
 0x176   : > { %2043 = vmatprep.mubr.msk.f32.mxu0 %vm2213_vm0, %v2214_v9 }
 0x179   : > { %2019 = vmatmul.mubr.msk.f32.vlgmr.msra.gmra.mrb[2].mxu1 %vm794_vm3, %v1903_v46 }
 0x17a   : > { %2033 = vmatprep.mubr.msk.f32.mxu1 %vm794_vm3, %v1904_v29  ;;  %2032 = vmatpush3.msra.mxu1 %v1113_v47 }
 0x17b   : > { %2036 = vmatprep.subr.mxu1 %v768_v40 }
 0x17d   : > { %2034 = vmatmul.mubr.msk.f32.vlgmr.msra.gmra.mrb[4].mxu1 %vm794_vm3, %v1905_v43  ;;  %v1928_v43 = vld [vmem:[%s2545_s13] ss:$0 sm:$0xff] }
 0x17e   : > { %2037 = vmatpush3.msra.mxu1 %v768_v40  ;;  %2038 = vmatprep.mubr.msk.f32.mxu1 %vm794_vm3, %v1902_v44 }
 0x17f   : > { %2046 = vmatprep.subr.mxu1 %v2214_v9 }
 0x185   : > { %2039 = vmatmul.mubr.msk.f32.vlgmr.msra.gmra.mrb[4].mxu1 %vm794_vm3, %v1903_v46 }
 0x186   : > { %2048 = vmatprep.mubr.msk.f32.mxu1 %vm2213_vm0, %v2214_v9 }
 0x248   : > { %v2030_v48 = vpop.f32.mrb[4].mxu0 }
 0x249   : > { %v1102_v49 = vpop.f32.mrb[5].mxu0 }
 0x24a   : > { %2042 = vmatpush3.xpose.msk.msra.mxu0 %vm794_vm3, %v1102_v49 }
 0x24b   : > { %2051 = vmatprep.subr.mxu0 %v2214_v9 }
 0x24c   : > { %v2020_v50 = vpop.f32.mrb[2].mxu1 }
 0x24d   : > { %v948_v51 = vpop.f32.mrb[3].mxu1 }
 0x24e   : > { %2044 = vmatmul.mubr.msk.f32.vlgmr.msra.gmra.mrb[6].mxu0 %vm794_vm3, %v948_v51 }
 0x24f   : > { %2052 = vmatpush3.xpose.msk.msra.mxu0 %vm794_vm3, %v2030_v48  ;;  %2053 = vmatprep.mubr.msk.f32.mxu0 %vm2213_vm0, %v2214_v9 }
 0x250   : > { %2061 = vmatprep.subr.mxu0 %v2214_v9 }
 0x252   : > { %2054 = vmatmul.mubr.msk.f32.vlgmr.msra.gmra.mrb[8].mxu0 %vm794_vm3, %v2020_v50 }
 0x253   : > { %2063 = vmatprep.mubr.msk.f32.mxu0 %vm2213_vm0, %v2214_v9  ;;  %2062 = vmatpush3.msra.mxu0 %v1266_v13 }
 0x258   : > { %v2040_v63 = vpop.f32.mrb[4].mxu1 }
 0x259   : > { %v1256_v0 = vpop.f32.mrb[5].mxu1 }
 0x25a   : > { %2047 = vmatpush3.msra.mxu1 %v1256_v0 }
 0x25b   : > { %2056 = vmatprep.subr.mxu1 %v2214_v9 }
 0x321   : > { %v1339_v53 = vpop.f32.mrb[6].mxu0 }
 0x322   : > { %v1343_v54 = vmul.f32 0.35355338, %v1339_v53  ;;  %v2045_v55 = vpop.f32.mrb[7].mxu0 }
 0x324   : > { %v1345_v56 = vsel %vm1344_vm7, -1e+09, %v1343_v54 }
 0x325   : > { %v1502_v57 = vpop.f32.mrb[8].mxu0  ;;  %v1346_v58 = vsel %vm794_vm3, %v1345_v56, -inf }
 0x326   : > { %v1506_v59 = vmul.f32 0.35355338, %v1502_v57  ;;  %1347 = vmax.xlane.f32.xlu1 %v1346_v58  ;;  %v2055_v60 = vpop.f32.mrb[9].mxu0 }
 0x328   : > { %v1507_v61 = vsel %vm1344_vm7, -1e+09, %v1506_v59 }
 0x329   : > { %v1508_v62 = vsel %vm794_vm3, %v1507_v61, -inf }
 0x32a   : > { %1509 = vmax.xlane.f32.xlu0 %v1508_v62 }
 0x3b3   : > { %v1348_v1 = vpop.xlane.xlu1 %1347 }
 0x3b4   : > { %v1349_v2 = vsub.f32 %v1345_v56, %v1348_v1 }
 0x3b6   : > { %v1350_v3 = vmul.f32 1.442695, %v1349_v2 }
 0x3b7   : > { %v1510_v4 = vpop.xlane.xlu0 %1509 }
 0x3b8   : > { %2138 = vpow2.f32 %v1350_v3  ;;  %v1511_v5 = vsub.f32 %v1507_v61, %v1510_v4 }
 0x3ba   : > { %v1512_v6 = vmul.f32 1.442695, %v1511_v5 }
 0x3bc   : > { %2140 = vpow2.f32 %v1512_v6 }
 0x3c2   : > { %v2139_v7 = vpop.eup %2138 }
 0x3c3   : > { %2049 = vmatmul.mubr.msk.f32.vlgmr.msra.gmra.mrb[6].mxu1 %vm794_vm3, %v2139_v7  ;;  %v1352_v8 = vsel %vm794_vm3, %v2139_v7, 0.0 }
 0x3c4   : > { %2057 = vmatpush3.msra.mxu1 %v2040_v63  ;;  %1353 = vadd.xlane.f32.xlu0 %v1352_v8 }
 0x3c5   : > { %2058 = vmatprep.mubr.msk.f32.mxu1 %vm2213_vm0, %v2214_v9  ;;  %2066 = vmatprep.subr.mxu1 %v2214_v9 }
 0x3c6   : > { %v2141_v10 = vpop.eup %2140 }
 0x3c7   : > { %2059 = vmatmul.mubr.msk.f32.vlgmr.msra.gmra.mrb[8].mxu1 %vm794_vm3, %v2141_v10  ;;  %v1514_v11 = vsel %vm794_vm3, %v2141_v10, 0.0 }
 0x3c8   : > { %1515 = vadd.xlane.f32.xlu1 %v1514_v11  ;;  %2068 = vmatprep.mubr.msk.f32.mxu1 %vm2213_vm0, %v2214_v9 }
 0x3c9   : > { %2067 = vmatpush3.msra.mxu1 %v1265_v12 }
 0x451   : > { %v1354_v14 = vpop.xlane.xlu0 %1353 }
 0x452   : > { %2142 = vrcp.f32 %v1354_v14 }
 0x455   : > { %v1516_v15 = vpop.xlane.xlu1 %1515 }
 0x456   : > { %2144 = vrcp.f32 %v1516_v15 }
 0x45c   : > { %v2143_v16 = vpop.eup %2142 }
 0x460   : > { %v2145_v9 = vpop.eup %2144 }
 0x496   : > { %v1425_v18 = vpop.f32.mrb[6].mxu1 }
 0x497   : > { %v1429_v19 = vmul.f32 %v2143_v16, %v1425_v18  ;;  %v2050_v20 = vpop.f32.mrb[7].mxu1 }
 0x499   : > { %2069 = vmatmul.mubr.msk.f32.vlgmr.msra.gmra.mrb[10].mxu1 %vm794_vm3, %v1429_v19 }
 0x49a   : > { %v1587_v21 = vpop.f32.mrb[8].mxu1 }
 0x49b   : > { %v1591_v22 = vmul.f32 %v2145_v9, %v1587_v21  ;;  %v2060_v23 = vpop.f32.mrb[9].mxu1 }
 0x49d   : > { %2064 = vmatmul.mubr.msk.f32.vlgmr.msra.gmra.mrb[10].mxu0 %vm794_vm3, %v1591_v22 }
 0x56c   : > { %v1734_v24 = vpop.f32.mrb[10].mxu1 }
 0x56d   : > { %v2070_v25 = vpop.f32.mrb[11].mxu1 }
 0x570   : > { %v1661_v26 = vpop.f32.mrb[10].mxu0 }
 0x571   : > { %v1735_v28 = vadd.f32 %v1734_v24, %v1661_v26  ;;  %v2065_v29 = vpop.f32.mrb[11].mxu0 }
 0x573   : > { %v1745_v30 = vadd.f32 %v1926_v27, %v1735_v28 }
 0x575   : > { %v1746_v31 = vadd.f32 %v1745_v30, %v2386_v17  ;;  %v1927_v17 = vld [vmem:[%s2544_s12] ss:$0 sm:$0xff] }
 0x577   : > { %v1747_v32 = vsel %vm529_vm1, %v1746_v31, 0.0 }
 0x578   : > { %1748 = vadd.xlane.f32.xlu0 %v1747_v32 }
 0x605   : > { %v1749_v33 = vpop.xlane.xlu0 %1748 }
 0x606   : > { %v1751_v34 = vmul.f32 0.03125, %v1749_v33 }
 0x608   : > { %v1752_v35 = vsub.f32 %v1746_v31, %v1751_v34 }
 0x60a   : > { %v1753_v36 = vmul.f32 %v1752_v35, %v1752_v35 }
 0x60c   : > { %v1754_v37 = vsel %vm529_vm1, %v1753_v36, 0.0 }
 0x60d   : > { %1755 = vadd.xlane.f32.xlu1 %v1754_v37 }
 0x69a   : > { %v1756_v38 = vpop.xlane.xlu1 %1755 }
 0x69b   : > { %v1757_v39 = vmul.f32 0.03125, %v1756_v38 }
 0x69d   : > { %v1758_v40 = vadd.f32 1e-05, %v1757_v39 }
 0x69f   : > { %2146 = vrsqrt.f32 %v1758_v40 }
 0x6a9   : > { %v2147_v41 = vpop.eup %2146 }
 0x6aa   : > { %v1760_v42 = vmul.f32 %v2147_v41, %v1752_v35 }
 0x6ac   : > { %v1768_v44 = vmul.f32 %v1927_v17, %v1760_v42 }
 0x6ae   : > { %v1776_v45 = vadd.f32 %v1928_v43, %v1768_v44 }
 0x6b0   : > { %1777 = vst.msk [vmem:[%s497_s19] sm:$0xff] %vm529_vm1, %v1776_v45 }
 0x6b1   : > { %2161 = shalt.err (!%p2158_p3)
}
 0x6b2   : > { %s2162_s15 = scalar_lea.hbm %s2489_s20, 128  ;;  %s2166_s19 = scalar_lea.hbm %s2546_s14, 256 }
 0x6b3   : > { %p2163_p4 = scmp.ne.s32.totalorder %s2489_s20, %s2162_s15  ;;  %p2167_p9 = scmp.lt.u32.totalorder %s2489_s20, %s2546_s14 }
 0x6b4   : > { %p2168_p10 = scmp.lt.u32.totalorder %s2166_s19, %s2162_s15  ;;  %p2170_p12 = scmp.lt.u32.totalorder %s2162_s15, %s2489_s20 }
 0x6b5   : > { %p2164_p7 = pnand %p2163_p4, %p2330_p5 }
 0x6b6   : > { %p2169_p11 = por %p2168_p10, %p2167_p9 }
 0x6b7   : > { %p2165_p8 = pneg %p2164_p7 }
 0x6b8   : > { %p2171_p13 = por %p2170_p12, %p2169_p11 }
 0x6ba   : > { %p2172_p0 = pnand %p2171_p13, %p2165_p8 }
 0x6bc   : > { %2175 = shalt.err (!%p2172_p0)
}
 0x6bd   : > { %2095 = dma.vmem_to_hbm [thread:$0]  (%p2330_p5), %s2491_s28, 128, %s2489_s20, %s1779_s26  }
 0x6be PF: > { %p2101_p1 = scmp.ge.s32.totalorder %s2210_s16, 2  ;;  %s1804_s27 = sand.u32 1, %s2198_s29  }
 0x6bf   : > { %s1805_s17 = scalar_lea.sflag [#allocation3], %s1804_s27 }
 0x6c0   : > { %p2098_p2 = pnand %p2101_p1, %p2334_p6 }
 0x6c2   : > { %2193 = dma.done.wait (!%p2098_p2), %s1805_s17, 128  }
 0x6c3   : > { %2195 = vsyncadd (!%p2098_p2), %s1805_s17, 4294967168  ;;  %s2559_s16 = sld [smem:[#allocation6_spill]]  ;;  %s2560_s25 = sld [smem:[#allocation5_spill]] }
 0x6c4   : > { %s2561_s15 = sld [smem:[#allocation7_spill]]  ;;  %s2562_s29 = smov %s2202_s30 }
 0x6c9   : > { %p24_p3 = scmp.ge.s32.totalorder %s2559_s16, 4   ;;  %s2563_s30 = smov %s2560_s25 }
 0x6cb   :  { %26 = sbr.rel (!%p24_p3) target bundleno = 6 (0x6), region = 120 }
 0x6d2   :  { %1810 = vsyncpa [#allocation3], 1 }
 0x6d3   :  { %1812 = vsyncpa [#allocation3 + $0x1], 1 }

</bundles_post_ra>
